<compile_context>
chip_gen: v7x
topology: tpu7x:2x2x1
jax: 0.10.0
libtpu: 0.0.40
codegen_flags: <defaults>
</compile_context>

<pallas_src>
import functools

import jax
import jax.numpy as jnp
from jax import lax
from jax.experimental import pallas as pl
from jax.experimental.pallas import tpu as pltpu


def _round_up(x, mult):
    return ((x + mult - 1) // mult) * mult


def _round_down(x, mult):
    return (x // mult) * mult


def _objective_kernel(r_ref, p_ref, u_ref, v_ref, x_ref, out_ref, *,
                      m, tm, gamma1, lambda1):
    i = pl.program_id(0)

    u = u_ref[...]                                              # (tm, k)

    # Row-validity mask for the (possibly partial) last tile.  Select (not
    # multiply) so any unspecified padding data in a partial block is dropped.
    row = lax.broadcasted_iota(jnp.int32, (tm, 1), 0) + i * tm
    row_mask = row < m                                          # (tm, 1)

    # Two MXU matmuls against the resident factor matrices; contraction on the
    # trailing dims of both operands -> no materialized transpose.
    mm_r = lax.dot_general(u, v_ref[...], (((1,), (1,)), ((), ())),
                           preferred_element_type=jnp.float32)  # (tm, n)
    mm_p = lax.dot_general(u, x_ref[...], (((1,), (1,)), ((), ())),
                           preferred_element_type=jnp.float32)  # (tm, p)

    dR = jnp.where(row_mask, r_ref[...].astype(jnp.float32) - mm_r, 0.0)
    dP = jnp.where(row_mask, p_ref[...].astype(jnp.float32) - mm_p, 0.0)
    u_f32 = jnp.where(row_mask, u.astype(jnp.float32), 0.0)

    partial = (0.5 * jnp.sum(dR * dR)
               + 0.5 * gamma1 * jnp.sum(dP * dP)
               + 0.5 * lambda1 * jnp.sum(u_f32 * u_f32))

    # Lane-dense per-tile partial; wrapper reduces partials[:, 0, 0].
    out_ref[...] = jnp.full(out_ref.shape, partial, dtype=jnp.float32)


def amf_objective(R, P, Q, U, V, X, Y, *, gamma1, gamma2, lambda1,
                  block_m=None):
    """Pallas wrapper computing the scalar AMF objective."""
    m, n = R.shape
    p = P.shape[1]
    k = U.shape[1]
    itemsize = 4  # streamed / resident data handled as f32

    # Generation-aware VMEM budgeting (v5e/v6e: 128 MiB, v7x: 64 MiB).
    try:
        vmem_cap = int(pltpu.get_tpu_info().vmem_capacity_bytes)
    except Exception:  # pragma: no cover - conservative fallback
        vmem_cap = 64 * 1024 * 1024

    resident_bytes = (int(V.size) + int(X.size)) * itemsize
    stream_budget = int(vmem_cap * 0.6) - resident_bytes
    per_row = 2 * (n + p + k) * itemsize          # double-buffered bytes / row
    tm_cap = max(8, stream_budget // per_row)
    tm = min(_round_down(tm_cap, 8), _round_up(m, 8))
    if block_m is not None:
        tm = min(tm, max(8, _round_up(block_m, 8)))
    tm = max(tm, 8)
    grid_m = pl.cdiv(m, tm)

    kernel = functools.partial(_objective_kernel, m=m, tm=tm,
                               gamma1=gamma1, lambda1=lambda1)

    flops = 2 * k * m * (n + p) + 6 * m * (n + p)
    bytes_accessed = (int(R.size) + int(P.size) + int(U.size)
                      + int(V.size) + int(X.size)) * itemsize \
        + grid_m * 8 * 128 * 4
    cost = pl.CostEstimate(flops=flops, transcendentals=0,
                           bytes_accessed=bytes_accessed)

    needed = 2 * tm * (n + p + k) * itemsize + resident_bytes + 2 * 4096
    vmem_limit = min(int(vmem_cap * 0.75),
                     max(32 * 1024 * 1024, needed + (8 << 20)))

    vmem_resident = pl.BlockSpec(memory_space=pltpu.MemorySpace.VMEM)

    partials = pl.pallas_call(
        kernel,
        out_shape=jax.ShapeDtypeStruct((grid_m, 8, 128), jnp.float32),
        grid_spec=pltpu.PrefetchScalarGridSpec(
            num_scalar_prefetch=0,
            grid=(grid_m,),
            in_specs=[
                pl.BlockSpec((tm, n), lambda i: (i, 0)),   # R row tile (stream)
                pl.BlockSpec((tm, p), lambda i: (i, 0)),   # P row tile (stream)
                pl.BlockSpec((tm, k), lambda i: (i, 0)),   # U row tile (stream)
                vmem_resident,                             # V (resident)
                vmem_resident,                             # X (resident)
            ],
            out_specs=pl.BlockSpec((1, 8, 128), lambda i: (i, 0, 0)),
        ),
        compiler_params=pltpu.CompilerParams(
            dimension_semantics=("parallel",),
            vmem_limit_bytes=vmem_limit,
        ),
        cost_estimate=cost,
    )(R, P, U, V, X)

    main_terms = jnp.sum(partials[:, 0, 0])

    # Small O(n*q*k) term + V/X/Y regularizers hoisted out of the kernel
    # (touched once; keeping them VMEM-resident only stole row-tile headroom).
    f32 = jnp.float32
    Vf = V.astype(f32)
    Xf = X.astype(f32)
    Yf = Y.astype(f32)
    dQ = Q.astype(f32) - Vf @ Yf.T
    q_term = 0.5 * gamma2 * jnp.sum(dQ * dQ)
    reg_rest = 0.5 * lambda1 * (jnp.sum(Vf * Vf) + jnp.sum(Xf * Xf)
                                + jnp.sum(Yf * Yf))
    return main_terms + q_term + reg_rest


def _reference(R, P, Q, U, V, X, Y, *, gamma1, gamma2, lambda1):
    frob = lambda a: jnp.sum(a.astype(jnp.float32) ** 2)
    t1 = 0.5 * frob(R - U @ V.T)
    t2 = 0.5 * gamma1 * frob(P - U @ X.T)
    t3 = 0.5 * gamma2 * frob(Q - V @ Y.T)
    reg = 0.5 * lambda1 * (frob(U) + frob(V) + frob(X) + frob(Y))
    return t1 + t2 + t3 + reg


if __name__ == "__main__":
    # Config hyper-parameters (deterministic, in-script).
    gamma1, gamma2, lambda1 = 0.7, 0.3, 0.01

    # Small shapes: m users, n items, p user-features, q item-features, k latent.
    # m = 20 with block_m = 8 -> 3 grid steps including a partial last tile,
    # exercising both the parallel partial-sum path and the row-mask path.
    m, n, p_dim, q_dim, k = 20, 24, 12, 20, 8

    key = jax.random.PRNGKey(0)
    kR, kP, kQ, kU, kV, kX, kY = jax.random.split(key, 7)
    R = jax.random.normal(kR, (m, n), dtype=jnp.float32)
    P = jax.random.normal(kP, (m, p_dim), dtype=jnp.float32)
    Q = jax.random.normal(kQ, (n, q_dim), dtype=jnp.float32)
    U = jax.random.normal(kU, (m, k), dtype=jnp.float32)
    V = jax.random.normal(kV, (n, k), dtype=jnp.float32)
    X = jax.random.normal(kX, (p_dim, k), dtype=jnp.float32)
    Y = jax.random.normal(kY, (q_dim, k), dtype=jnp.float32)

    loss = amf_objective(R, P, Q, U, V, X, Y,
                         gamma1=gamma1, gamma2=gamma2, lambda1=lambda1,
                         block_m=8)
    loss = jax.block_until_ready(loss)

    ref = _reference(R, P, Q, U, V, X, Y,
                     gamma1=gamma1, gamma2=gamma2, lambda1=lambda1)
    assert jnp.allclose(loss, ref, rtol=1e-5, atol=1e-4), (loss, ref)

    print("KERNEL_OK")
</pallas_src>

<mosaic_0001>
module attributes {stable_mosaic.version = 11 : i64} {
  func.func @_objective_kernel(%arg0: i32, %arg1: memref<8x24xf32, #tpu.memory_space<vmem>>, %arg2: memref<8x12xf32, #tpu.memory_space<vmem>>, %arg3: memref<8x8xf32, #tpu.memory_space<vmem>>, %arg4: memref<24x8xf32, #tpu.memory_space<vmem>>, %arg5: memref<12x8xf32, #tpu.memory_space<vmem>>, %arg6: memref<1x8x128xf32, #tpu.memory_space<vmem>>) attributes {dimension_semantics = [#tpu.dimension_semantics<parallel>], iteration_bounds = array<i64: 3>, scalar_prefetch = 0 : i64, scratch_operands = 0 : i64, tpu.core_type = #tpu.core_type<tc>, window_params = [{transform_indices = @transform_0, window_bounds = array<i64: 8, 24>}, {transform_indices = @transform_1, window_bounds = array<i64: 8, 12>}, {transform_indices = @transform_2, window_bounds = array<i64: 8, 8>}, {pipeline_mode = #tpu.pipeline_mode<synchronous>, transform_indices = @transform_3, window_bounds = array<i64: 24, 8>}, {pipeline_mode = #tpu.pipeline_mode<synchronous>, transform_indices = @transform_4, window_bounds = array<i64: 12, 8>}, {transform_indices = @transform_5, window_bounds = array<i64: 1, 8, 128>}]} {
    %c0 = arith.constant 0 : index
    %c0_0 = arith.constant 0 : index
    %0 = vector.load %arg3[%c0, %c0_0] : memref<8x8xf32, #tpu.memory_space<vmem>>, vector<8x8xf32>
    %1 = tpu.iota {dimensions = array<i32: 0>} : vector<8x1xi32>
    %c8_i32 = arith.constant 8 : i32
    %2 = arith.muli %arg0, %c8_i32 : i32
    %3 = vector.broadcast %2 : i32 to vector<8x1xi32>
    %4 = arith.addi %1, %3 : vector<8x1xi32>
    %c20_i32 = arith.constant 20 : i32
    %5 = vector.broadcast %c20_i32 : i32 to vector<8x1xi32>
    %6 = arith.cmpi slt, %4, %5 : vector<8x1xi32>
    %c0_1 = arith.constant 0 : index
    %c0_2 = arith.constant 0 : index
    %7 = vector.load %arg4[%c0_1, %c0_2] : memref<24x8xf32, #tpu.memory_space<vmem>>, vector<24x8xf32>
    %cst = arith.constant dense<0.000000e+00> : vector<8x24xf32>
    %8 = tpu.matmul %0, %7, %cst {dimension_numbers = #tpu.dot_dimension_numbers<[1], [1], [0], [0], [0, 0, 1, 0], [], []>} : vector<8x8xf32>, vector<24x8xf32>, vector<8x24xf32> -> vector<8x24xf32>
    %c0_3 = arith.constant 0 : index
    %c0_4 = arith.constant 0 : index
    %9 = vector.load %arg5[%c0_3, %c0_4] : memref<12x8xf32, #tpu.memory_space<vmem>>, vector<12x8xf32>
    %cst_5 = arith.constant dense<0.000000e+00> : vector<8x12xf32>
    %10 = tpu.matmul %0, %9, %cst_5 {dimension_numbers = #tpu.dot_dimension_numbers<[1], [1], [0], [0], [0, 0, 1, 0], [], []>} : vector<8x8xf32>, vector<12x8xf32>, vector<8x12xf32> -> vector<8x12xf32>
    %c0_6 = arith.constant 0 : index
    %c0_7 = arith.constant 0 : index
    %11 = vector.load %arg1[%c0_6, %c0_7] : memref<8x24xf32, #tpu.memory_space<vmem>>, vector<8x24xf32>
    %12 = arith.subf %11, %8 : vector<8x24xf32>
    %cst_8 = arith.constant 0.000000e+00 : f32
    %13 = vector.shape_cast %6 : vector<8x1xi1> to vector<8x1xi1>
    %14 = vector.broadcast %13 : vector<8x1xi1> to vector<8x24xi1>
    %15 = vector.broadcast %cst_8 : f32 to vector<8x24xf32>
    %16 = arith.select %14, %12, %15 : vector<8x24xi1>, vector<8x24xf32>
    %c0_9 = arith.constant 0 : index
    %c0_10 = arith.constant 0 : index
    %17 = vector.load %arg2[%c0_9, %c0_10] : memref<8x12xf32, #tpu.memory_space<vmem>>, vector<8x12xf32>
    %18 = arith.subf %17, %10 : vector<8x12xf32>
    %cst_11 = arith.constant 0.000000e+00 : f32
    %19 = vector.shape_cast %6 : vector<8x1xi1> to vector<8x1xi1>
    %20 = vector.broadcast %19 : vector<8x1xi1> to vector<8x12xi1>
    %21 = vector.broadcast %cst_11 : f32 to vector<8x12xf32>
    %22 = arith.select %20, %18, %21 : vector<8x12xi1>, vector<8x12xf32>
    %cst_12 = arith.constant 0.000000e+00 : f32
    %23 = vector.shape_cast %6 : vector<8x1xi1> to vector<8x1xi1>
    %24 = vector.broadcast %23 : vector<8x1xi1> to vector<8x8xi1>
    %25 = vector.broadcast %cst_12 : f32 to vector<8x8xf32>
    %26 = arith.select %24, %0, %25 : vector<8x8xi1>, vector<8x8xf32>
    %27 = arith.mulf %16, %16 : vector<8x24xf32>
    %28 = vector.shape_cast %27 : vector<8x24xf32> to vector<1x8x24xf32>
    %cst_13 = arith.constant dense<0.000000e+00> : vector<1xf32>
    %29 = vector.multi_reduction <add>, %28, %cst_13 [1, 2] : vector<1x8x24xf32> to vector<1xf32>
    %30 = vector.shape_cast %29 : vector<1xf32> to vector<1x1x1xf32>
    %31 = vector.extract %30[0, 0, 0] : f32 from vector<1x1x1xf32>
    %cst_14 = arith.constant 5.000000e-01 : f32
    %32 = arith.mulf %cst_14, %31 : f32
    %33 = arith.mulf %22, %22 : vector<8x12xf32>
    %34 = vector.shape_cast %33 : vector<8x12xf32> to vector<1x8x12xf32>
    %cst_15 = arith.constant dense<0.000000e+00> : vector<1xf32>
    %35 = vector.multi_reduction <add>, %34, %cst_15 [1, 2] : vector<1x8x12xf32> to vector<1xf32>
    %36 = vector.shape_cast %35 : vector<1xf32> to vector<1x1x1xf32>
    %37 = vector.extract %36[0, 0, 0] : f32 from vector<1x1x1xf32>
    %cst_16 = arith.constant 3.500000e-01 : f32
    %38 = arith.mulf %cst_16, %37 : f32
    %39 = arith.addf %32, %38 : f32
    %40 = arith.mulf %26, %26 : vector<8x8xf32>
    %41 = vector.shape_cast %40 : vector<8x8xf32> to vector<1x8x8xf32>
    %cst_17 = arith.constant dense<0.000000e+00> : vector<1xf32>
    %42 = vector.multi_reduction <add>, %41, %cst_17 [1, 2] : vector<1x8x8xf32> to vector<1xf32>
    %43 = vector.shape_cast %42 : vector<1xf32> to vector<1x1x1xf32>
    %44 = vector.extract %43[0, 0, 0] : f32 from vector<1x1x1xf32>
    %cst_18 = arith.constant 5.000000e-03 : f32
    %45 = arith.mulf %cst_18, %44 : f32
    %46 = arith.addf %39, %45 : f32
    %47 = vector.broadcast %46 : f32 to vector<1x8x128xf32>
    %c0_19 = arith.constant 0 : index
    %c0_20 = arith.constant 0 : index
    %c0_21 = arith.constant 0 : index
    %48 = vector.load %arg6[%c0_19, %c0_20, %c0_21] : memref<1x8x128xf32, #tpu.memory_space<vmem>>, vector<1x8x128xf32>
    tpu.vector_store %arg6[%c0_19, %c0_20, %c0_21], %47 {strides = array<i32>} : memref<1x8x128xf32, #tpu.memory_space<vmem>>, vector<1x8x128xf32>,
    return
  }
  func.func @transform_0(%arg0: i32) -> (i32, i32) {
    %c0_i32 = arith.constant 0 : i32
    %c0_i32_0 = arith.constant 0 : i32
    return %arg0, %c0_i32 : i32, i32
  }
  func.func @transform_1(%arg0: i32) -> (i32, i32) {
    %c0_i32 = arith.constant 0 : i32
    %c0_i32_0 = arith.constant 0 : i32
    return %arg0, %c0_i32 : i32, i32
  }
  func.func @transform_2(%arg0: i32) -> (i32, i32) {
    %c0_i32 = arith.constant 0 : i32
    %c0_i32_0 = arith.constant 0 : i32
    return %arg0, %c0_i32 : i32, i32
  }
  func.func @transform_3(%arg0: i32) -> (i32, i32) {
    %c0_i32 = arith.constant 0 : i32
    %c0_i32_0 = arith.constant 0 : i32
    %c0_i32_1 = arith.constant 0 : i32
    return %c0_i32, %c0_i32_0 : i32, i32
  }
  func.func @transform_4(%arg0: i32) -> (i32, i32) {
    %c0_i32 = arith.constant 0 : i32
    %c0_i32_0 = arith.constant 0 : i32
    %c0_i32_1 = arith.constant 0 : i32
    return %c0_i32, %c0_i32_0 : i32, i32
  }
  func.func @transform_5(%arg0: i32) -> (i32, i32, i32) {
    %c0_i32 = arith.constant 0 : i32
    %c0_i32_0 = arith.constant 0 : i32
    %c0_i32_1 = arith.constant 0 : i32
    return %arg0, %c0_i32, %c0_i32_0 : i32, i32, i32
  }
}

</mosaic_0001>

<bundles_post_ra>
// kernel: tpu_custom_call.1
= control target key start
LH: loop header
LB: loop body
LE: loop exit
PB: predicated region body
PF: predicated region fallthrough
CT: control target
= control target key end

     0   :  { %10 = vsyncpa [#allocation3], 0  ;;  %s901_s0 = inlined_call_operand.vmem [shape: f32[20,24], index: 0, kind: input, shape index: {}]   ;;  %s902_s1 = inlined_call_operand.vmem [shape: f32[20,12], index: 1, kind: input, shape index: {}]   ;;  %s903_s2 = inlined_call_operand.vmem [shape: f32[20,8], index: 2, kind: input, shape index: {}]   ;;  %s904_s3 = inlined_call_operand.vmem [shape: f32[24,8], index: 3, kind: input, shape index: {}]   ;;  %s905_s4 = inlined_call_operand.vmem [shape: f32[12,8], index: 4, kind: input, shape index: {}]   ;;  %s906_s5 = inlined_call_operand.hbm [shape: f32[3,8,128], index: 5, kind: output, shape index: {}]  }
   0x1   :  { %12 = vsyncpa [#allocation3 + $0x1], 0  ;;  %s770_s18 = smov 0   ;;  %s772_s19 = smov 0  }
   0x2   :  { %s774_s20 = smov 0   ;;  %s776_s21 = smov 0  }
   0x3 LB: > { %s791_s22 = sadd.s32 4294967295, %s734_s21   ;;  %s573_s23 = sadd.s32 4294967294, %s734_s21   ;;  %s734_s21 = sphi %s776_s21, %s912_s21   ;;  %s730_s20 = sphi %s774_s20, %s911_s20   ;;  %s726_s19 = sphi %s772_s19, %s910_s19   ;;  %s722_s18 = sphi %s770_s18, %s909_s18  }
   0x4   : > { %s795_s24 = sadd.s32 1, %s734_s21   ;;  %s145_s25 = sadd.s32 1, %s730_s20 }
   0x5   : > { %s142_s26 = ssub.s32 %s734_s21, %s795_s24  ;;  %p155_p0 = scmp.ne.s32.totalorder %s730_s20, %s726_s19 }
   0x6   : > { %p143_p1 = scmp.eq.s32.totalorder %s142_s26, 0  ;;  %p156_p2 = scmp.eq.s32.totalorder %s791_s22, 2 }
   0x7   : > { %p161_p3 = scmp.ne.s32.totalorder %s726_s19, %s722_s18  ;;  %p162_p4 = scmp.eq.s32.totalorder %s573_s23, 2 }
   0x8   : > { %s806_s27 = scalar_select %p143_p1, %s730_s20, %s145_s25  }
   0x9   : > { %p808_p5 = por %p156_p2, %p155_p0  ;;  %p812_p6 = por %p162_p4, %p161_p3 }
   0xa   : > { %p576_p7 = scmp.ge.s32.totalorder %s734_s21, 1  ;;  %p207_p8 = scmp.lt.s32.totalorder %s734_s21, 4 }
   0xc   : > { %p208_p9 = pnand %p576_p7, %p207_p8 }
   0xd   : > { %v261_v0 = vld [vmem:[%s904_s3] sm:$0xff] (!%p208_p9)  ;;  %v262_v1 = vld [vmem:[%s904_s3 + $0x8] sm:$0xff] (!%p208_p9)  ;;  %vm264_vm0 = vcmask (!%p208_p9), 64512   ;;  %v736_v3 = vmov (!%p208_p9), 0.0|0.0   ;;  %p242_p10 = scmp.lt.s32.totalorder (!%p208_p9), %s791_s22, 2  ;;  %vm737_vm2 = vmmov (!%p208_p9), 0   ;;  %v255_v10 = vlaneseq (!%p208_p9) }
   0xe   : > { %211 = sbr.rel (%p208_p9) target bundleno = 477 (0x1dd), region = 40  ;;  %v347_v2 = vld [vmem:[%s905_s4] sm:$0xff] (!%p208_p9)  ;;  %616 = vmatprep.subr.bf16.mxu0 (!%p208_p9), %v736_v3  ;;  %v617_v4 = vpack.c.bf16 (!%p208_p9), %v262_v1, %v261_v0  ;;  %vm618_vm1 = vmpackc.low (!%p208_p9), %vm264_vm0, %vm264_vm0  ;;  %620 = vmatprep.subr.bf16.mxu1 (!%p208_p9), %v736_v3  ;;  %v348_v5 = vld [vmem:[%s905_s4 + $0x8] sm:$0xf] (!%p208_p9)  ;;  %v738_v7 = vmov (!%p208_p9), 0.0   ;;  %s581_s26 = sshll.u32 (!%p208_p9), %s791_s22, 3 }
   0xf   : > { %v621_v6 = vpack.c.bf16 (!%p208_p9), %v348_v5, %v347_v2  ;;  %606 = vmatprep.mubr.msk.f32.mxu0 (!%p208_p9), %vm737_vm2, %v738_v7  ;;  %613 = vmatprep.mubr.msk.f32.mxu1 (!%p208_p9), %vm737_vm2, %v738_v7  ;;  %v263_v8 = vld [vmem:[%s904_s3 + $0x10] sm:$0xff] (!%p208_p9)  ;;  %v256_v11 = vshrl.u32 (!%p208_p9), %v255_v10, 7  ;;  %v258_v12 = vstv (!%p208_p9), %s581_s26  ;;  %vm435_vm4 = vcmask (!%p208_p9), 195584   ;;  %s239_s11 = sand.u32 (!%p208_p9), 1, %s726_s19   ;;  %s590_s23 = sshll.u32 (!%p208_p9), %s791_s22, 7 }
  0x10   : > { %619 = vmatpush3.bf16.xpose.msk.msra.mxu0 (!%p208_p9), %vm618_vm1, %v617_v4  ;;  %vm448_vm5 = vcmask (!%p208_p9), 97280   ;;  %s577_s12 = sshll.u32 (!%p208_p9), %s239_s11, 3 }
  0x11   : > { %604 = vmatprep.subr.mxu0 (!%p208_p9), %v738_v7  ;;  %623 = vmatpush3.bf16.xpose.msk.msra.mxu1 (!%p208_p9), %vm618_vm1, %v621_v6  ;;  %v259_v13 = vadd.s32 (!%p208_p9), %v258_v12, %v256_v11  ;;  %s241_s25 = scalar_lea.vmem (!%p208_p9), [#allocation2], %s577_s12 }
  0x12   : > { %s490_s26 = sshll.u32 (!%p208_p9), %s241_s25, 4  ;;  %s861_s26 = int_to_ptr.vmem [resolvable:$true] %s490_s26 }
  0x13   : > { %vm260_vm3 = vcmp.lt.s32.totalorder (!%p208_p9), %v259_v13, 20 }
  0x15   : > { %s243_s13 = scalar_select %p242_p10, %s791_s22, 2 }
  0x16   : > { %s739_s22 = smov [#allocation2]  }
  0x17   : > { %s578_s14 = sshll.u32 %s243_s13, 3  ;;  %s676_s12 = sshll.u32 %s739_s22, 4  ;;  %s677_s12 = int_to_ptr.vmem [resolvable:$false] %s676_s12 }
  0x18   : > { %s253_s17 = scalar_lea.vmem %s903_s2, %s578_s14  ;;  %605 = vmatpush3.xpose.msk.msra.mxu0 %vm264_vm0, %v263_v8  ;;  %s249_s7 = scalar_lea.vmem %s902_s1, %s578_s14 }
  0x19   : > { %v254_v9 = vld [vmem:[%s253_s17] sm:$0xff]  ;;  %s245_s10 = scalar_lea.vmem %s901_s0, %s578_s14  ;;  %p679_p0 = scmp.lt.s32.totalorder %s861_s26, %s677_s12 }
  0x1a   : > { %614 = vmatmul.mubr.msk.f32.vlgmr.msra.gmra.mrb[0].mxu1 %vm264_vm0, %v254_v9  ;;  %v433_v14 = vsel %vm260_vm3, %v254_v9, 0.0  ;;  %v430_v17 = vld [vmem:[%s249_s7] sm:$0xff] }
  0x1b   : > { %607 = vmatmul.mubr.msk.f32.vlgmr.msra.gmra.mrb[0].mxu0 %vm264_vm0, %v254_v9  ;;  %v461_v15 = vmul.f32 %v433_v14, %v433_v14  ;;  %v425_v19 = vld [vmem:[%s245_s10] sm:$0xff]  ;;  %s859_s10 = scalar_lea.hbm %s906_s5, %s590_s23 }
  0x1d   : > { %v462_v16 = vsel %vm264_vm0, %v461_v15, 0.0 }
  0x1e   : > { %463 = vadd.xlane.f32.xlu1 %v462_v16 }
  0xab   : > { %v464_v31 = vpop.xlane.xlu1 %463 }
  0xac   : > { %v465_v32 = vrot.slane %v464_v31, 4 }
  0xae   : > { %v466_v33 = vadd.f32 %v465_v32, %v464_v31 }
  0xb0   : > { %v467_v37 = vrot.slane %v466_v33, 2 }
  0xb2   : > { %v468_v43 = vadd.f32 %v467_v37, %v466_v33 }
  0xb4   : > { %v469_v48 = vrot.slane %v468_v43, 1 }
  0xb6   : > { %v470_v51 = vadd.f32 %v469_v48, %v468_v43 }
  0xed   : > { %v421_v18 = vpop.f32.mrb[0].mxu1 }
  0xee   : > { %v431_v20 = vsub.f32 %v430_v17, %v421_v18  ;;  %v615_v21 = vpop.f32.mrb[1].mxu1  ;;  %v343_v22 = vpop.f32.mrb[0].mxu0 }
  0xef   : > { %v426_v23 = vsub.f32 %v425_v19, %v343_v22  ;;  %v608_v24 = vpop.f32.mrb[1].mxu0 }
  0xf0   : > { %v432_v25 = vsel %vm260_vm3, %v431_v20, 0.0 }
  0xf1   : > { %v429_v26 = vsel %vm260_vm3, %v426_v23, 0.0  ;;  %v447_v28 = vmul.f32 %v432_v25, %v432_v25 }
  0xf2   : > { %v434_v27 = vmul.f32 %v429_v26, %v429_v26 }
  0xf3   : > { %v449_v30 = vsel %vm448_vm5, %v447_v28, 0.0 }
  0xf4   : > { %v436_v29 = vsel %vm435_vm4, %v434_v27, 0.0 }
  0xf5   : > { %437 = vadd.xlane.f32.xlu0 %v436_v29 }
  0xf9   : > { %450 = vadd.xlane.f32.xlu0 %v449_v30 }
 0x182   : > { %v438_v34 = vpop.xlane.xlu0 %437 }
 0x183   : > { %v439_v35 = vrot.slane %v438_v34, 4 }
 0x185   : > { %v440_v36 = vadd.f32 %v439_v35, %v438_v34 }
 0x186   : > { %v451_v38 = vpop.xlane.xlu0 %450 }
 0x187   : > { %v441_v39 = vrot.slane %v440_v36, 2  ;;  %v452_v40 = vrot.slane %v451_v38, 4 }
 0x189   : > { %v453_v41 = vadd.f32 %v452_v40, %v451_v38  ;;  %v442_v42 = vadd.f32 %v441_v39, %v440_v36 }
 0x18b   : > { %v454_v44 = vrot.slane %v453_v41, 2  ;;  %v443_v45 = vrot.slane %v442_v42, 1 }
 0x18d   : > { %v455_v46 = vadd.f32 %v454_v44, %v453_v41  ;;  %v444_v47 = vadd.f32 %v443_v45, %v442_v42 }
 0x18f   : > { %624 = vpush %v444_v47  ;;  %v456_v49 = vrot.slane %v455_v46, 1 }
 0x191   : > { %v457_v50 = vadd.f32 %v456_v49, %v455_v46 }
 0x193   : > { %626 = vpush %v457_v50 }
 0x194   : > { %628 = vpush %v470_v51 }
 0x1c0   : > { %s625_s13 = spop %624 }
 0x1c1   : > { %s446_s14 = smul.f32 0.5, %s625_s13  ;;  %s477_s13 = scalar_lea.sflag [#allocation3], %s239_s11 }
 0x1c4   : > { %s627_s15 = spop %626 }
 0x1c5   : > { %s459_s16 = smul.f32 0.35, %s627_s15  ;;  %s629_s17 = spop %628 }
 0x1c6   : > { %s472_s6 = smul.f32 0.005, %s629_s17  ;;  %s672_s15 = scalar_lea.vmem %s861_s26, 128 }
 0x1c7   : > { %s460_s30 = sadd.f32 %s459_s16, %s446_s14  ;;  %p673_p11 = scmp.ne.s32.totalorder %s861_s26, %s672_s15 }
 0x1c8   : > { %s678_s14 = scalar_lea.vmem %s677_s12, 256 }
 0x1c9   : > { %s473_s7 = sadd.f32 %s472_s6, %s460_s30  ;;  %p674_p12 = pnand %p673_p11, %p808_p5 }
 0x1ca   : > { %p680_p1 = scmp.lt.s32.totalorder %s678_s14, %s672_s15 }
 0x1cb   : > { %v474_v52 = vstv %s473_s7  ;;  %p675_p13 = pneg %p674_p12 }
 0x1cc   : > { %475 = vst [vmem:[%s241_s25] sm:$0xff] %v474_v52  ;;  %p681_p2 = por %p680_p1, %p679_p0 }
 0x1ce   : > { %p682_p3 = pnand %p681_p2, %p675_p13 }
 0x1d0   : > { %685 = shalt.err (!%p682_p3)
}
 0x1d1   : > { %s686_s11 = scalar_lea.hbm %s859_s10, 128  ;;  %s690_s23 = scalar_lea.hbm %s906_s5, 384 }
 0x1d2   : > { %p687_p4 = scmp.ne.s32.totalorder %s859_s10, %s686_s11  ;;  %p691_p9 = scmp.lt.u32.totalorder %s859_s10, %s906_s5 }
 0x1d3   : > { %p692_p10 = scmp.lt.u32.totalorder %s690_s23, %s686_s11  ;;  %p694_p12 = scmp.lt.u32.totalorder %s686_s11, %s859_s10 }
 0x1d4   : > { %p688_p7 = pnand %p687_p4, %p808_p5 }
 0x1d5   : > { %p693_p11 = por %p692_p10, %p691_p9 }
 0x1d6   : > { %p689_p8 = pneg %p688_p7 }
 0x1d7   : > { %p695_p13 = por %p694_p12, %p693_p11 }
 0x1d9   : > { %p696_p0 = pnand %p695_p13, %p689_p8 }
 0x1db   : > { %699 = shalt.err (!%p696_p0)
}
 0x1dc   : > { %630 = dma.vmem_to_hbm [thread:$0]  (%p808_p5), %s861_s26, 128, %s859_s10, %s477_s13  }
 0x1dd PF: > { %p636_p1 = scmp.ge.s32.totalorder %s734_s21, 2  ;;  %s502_s6 = sand.u32 1, %s722_s18  }
 0x1de   : > { %s503_s7 = scalar_lea.sflag [#allocation3], %s502_s6 }
 0x1df   : > { %p633_p2 = pnand %p636_p1, %p812_p6 }
 0x1e1   : > { %717 = dma.done.wait (!%p633_p2), %s503_s7, 128  }
 0x1e2   : > { %719 = vsyncadd (!%p633_p2), %s503_s7, 4294967168  ;;  %p15_p3 = scmp.ge.s32.totalorder %s795_s24, 5   ;;  %s909_s18 = smov %s726_s19 }
 0x1e3   : > { %s910_s19 = smov %s730_s20  ;;  %s911_s20 = smov %s806_s27 }
 0x1e4   : > { %s912_s21 = smov %s795_s24  ;;  %17 = sbr.rel (!%p15_p3) target bundleno = 3 (0x3), region = 81 }
 0x1eb   :  { %508 = vsyncpa [#allocation3], 1 }
 0x1ec   :  { %510 = vsyncpa [#allocation3 + $0x1], 1 }

</bundles_post_ra>
